<compile_context>
chip_gen: v5e
topology: v5e:2x2
jax: 0.10.0
libtpu: 0.0.40
codegen_flags: <defaults>
</compile_context>

<pallas_src>
import functools

import jax
import jax.numpy as jnp
import numpy as np
from jax.experimental import pallas as pl
from jax.experimental.pallas import tpu as pltpu


# ----------------------------------------------------------------------------- kernels
def _series_decomp_kernel_blc(m_ref, x_ref, res_ref, mean_ref):
    # Fast path: m_ref (L, L) constant matrix, x_ref (1, L, Ct) lane-dense block.
    x = x_ref[0]                                                   # (L, Ct), native dtype
    mean = jnp.dot(m_ref[...], x.astype(m_ref.dtype),
                   preferred_element_type=jnp.float32)             # MXU
    mean_c = mean.astype(mean_ref.dtype)
    mean_ref[0] = mean_c
    res_ref[0] = (x - mean_c).astype(res_ref.dtype)


def _series_decomp_kernel_ln(m_ref, x_ref, res_ref, mean_ref):
    # Fallback: m_ref (L, L); x_ref (L, TN) time-major, lane-padded slab of B*C series.
    x = x_ref[...]
    mean = jnp.dot(m_ref[...], x.astype(m_ref.dtype),
                   preferred_element_type=jnp.float32)             # MXU
    mean_c = mean.astype(mean_ref.dtype)
    mean_ref[...] = mean_c
    res_ref[...] = (x - mean_c).astype(res_ref.dtype)


# ----------------------------------------------------------------------------- helpers
def _moving_avg_matrix(L: int, kernel_size: int) -> jax.Array:
    """(L, L) matrix M with (M @ x)[t] == AvgPool1d(k, stride=1)(replicate-padded x)[t]."""
    p = (kernel_size - 1) // 2
    q = kernel_size - 1 - p
    t = np.arange(L)[:, None]
    j = np.arange(L)[None, :]
    m = ((j >= np.maximum(t - p, 0)) & (j <= np.minimum(t + q, L - 1))).astype(np.float32)
    m[:, 0] += np.maximum(p - t[:, 0], 0)             # replicated-front contributions
    m[:, -1] += np.maximum(t[:, 0] + q - (L - 1), 0)  # replicated-end contributions
    return jnp.asarray(m / float(kernel_size), dtype=jnp.float32)


def _matrix_spec(L: int, index_map):
    """BlockSpec for the constant averaging matrix: single-buffered (it is fetched once)."""
    try:
        return pl.BlockSpec((L, L), index_map, pipeline_mode=pl.Buffered(1))
    except TypeError:  # older jax without pipeline_mode kwarg
        return pl.BlockSpec((L, L), index_map)


def _vmem_budget_and_cores():
    """(~75% of per-TensorCore VMEM, #TensorCores-per-chip heuristic)."""
    vmem_cap = 64 << 20  # conservative default (v7x per-TC VMEM)
    try:
        info = pltpu.get_tpu_info()
        vmem_cap = int(getattr(info, "vmem_capacity_bytes", vmem_cap))
    except Exception:
        pass
    # v7x: 64 MiB/TC and 2 TCs per chip; v5e/v6e: 128 MiB, single TC.
    num_tc = 2 if vmem_cap <= (64 << 20) else 1
    return (vmem_cap * 3) // 4, num_tc


def _vmem_estimate(L: int, tn: int, x_itemsize: int, m_bytes: int) -> int:
    return (m_bytes                        # averaging matrix (single-buffered)
            + 2 * L * tn * x_itemsize      # input tile (double-buffered)
            + 4 * L * tn * x_itemsize      # two output tiles (double-buffered)
            + L * tn * 4                   # f32 matmul result
            + (2 << 20))                   # headroom


def _pick_lane_tile(lane_total, L, x_itemsize, m_bytes, budget, outer_steps, num_tc):
    """Largest multiple-of-128 divisor of lane_total whose working set fits the VMEM
    budget, preferring enough total grid steps to feed every TensorCore."""
    cands = [t for t in range(128, lane_total + 1, 128) if lane_total % t == 0]
    if not cands:
        return None
    fit = [t for t in cands if _vmem_estimate(L, t, x_itemsize, m_bytes) <= budget]
    if not fit:
        fit = [min(cands)]
    pref = [t for t in fit if outer_steps * (lane_total // t) >= num_tc]
    return max(pref) if pref else max(fit)


# ----------------------------------------------------------------------------- wrapper
def series_decomp(x: jax.Array, kernel_size: int):
    """x: [B, L, C].  Returns (res, moving_mean), each [B, L, C]."""
    if kernel_size < 1 or kernel_size % 2 == 0:
        # The PyTorch module only works for odd kernel_size: with even k the moving
        # mean is one step shorter and `x - moving_mean` shape-mismatches.
        raise ValueError("series_decomp requires an odd kernel_size >= 1")
    B, L, C = x.shape
    x_itemsize = jnp.dtype(x.dtype).itemsize

    # bf16 inputs: bf16 matrix (bf16 MXU rate); otherwise keep the exact f32 matrix.
    m_dtype = jnp.bfloat16 if x.dtype == jnp.bfloat16 else jnp.float32
    m = _moving_avg_matrix(L, kernel_size).astype(m_dtype)
    m_bytes = L * L * jnp.dtype(m_dtype).itemsize

    budget, num_tc = _vmem_budget_and_cores()

    if C % 128 == 0:
        # ---------------- fast path: no layout change, lane-dense blocks of [B, L, C]
        ct = _pick_lane_tile(C, L, x_itemsize, m_bytes, budget, B, num_tc)
        est = _vmem_estimate(L, ct, x_itemsize, m_bytes)
        vmem_limit = int(min(max(est, 32 << 20), budget))
        cost = pl.CostEstimate(flops=2 * L * L * B * C,
                               transcendentals=0,
                               bytes_accessed=3 * B * L * C * x_itemsize + m_bytes)
        res, mean = pl.pallas_call(
            _series_decomp_kernel_blc,
            out_shape=(jax.ShapeDtypeStruct((B, L, C), x.dtype),
                       jax.ShapeDtypeStruct((B, L, C), x.dtype)),
            grid_spec=pltpu.PrefetchScalarGridSpec(
                num_scalar_prefetch=0,
                grid=(B, C // ct),
                in_specs=[
                    _matrix_spec(L, lambda b, c: (0, 0)),           # fetched once, reused
                    pl.BlockSpec((1, L, ct), lambda b, c: (b, 0, c)),
                ],
                out_specs=[
                    pl.BlockSpec((1, L, ct), lambda b, c: (b, 0, c)),
                    pl.BlockSpec((1, L, ct), lambda b, c: (b, 0, c)),
                ],
            ),
            compiler_params=pltpu.CompilerParams(
                dimension_semantics=("parallel", "parallel"),
                vmem_limit_bytes=vmem_limit,
            ),
            cost_estimate=cost,
        )(m, x)
        return res, mean

    # ---------------- fallback for lane-narrow C: time on sublanes, B*C on lanes,
    # lane dim zero-padded to a multiple of 128 (unmasked stores, no giant block).
    N = B * C
    n_pad = ((N + 127) // 128) * 128
    x2 = jnp.transpose(x, (1, 0, 2)).reshape(L, N)
    if n_pad != N:
        x2 = jnp.pad(x2, ((0, 0), (0, n_pad - N)))

    tn = _pick_lane_tile(n_pad, L, x_itemsize, m_bytes, budget, 1, num_tc)
    est = _vmem_estimate(L, tn, x_itemsize, m_bytes)
    vmem_limit = int(min(max(est, 32 << 20), budget))
    cost = pl.CostEstimate(flops=2 * L * L * n_pad,
                           transcendentals=0,
                           bytes_accessed=3 * L * n_pad * x_itemsize + m_bytes)
    res2, mean2 = pl.pallas_call(
        _series_decomp_kernel_ln,
        out_shape=(jax.ShapeDtypeStruct((L, n_pad), x.dtype),
                   jax.ShapeDtypeStruct((L, n_pad), x.dtype)),
        grid_spec=pltpu.PrefetchScalarGridSpec(
            num_scalar_prefetch=0,
            grid=(n_pad // tn,),
            in_specs=[
                _matrix_spec(L, lambda n: (0, 0)),                  # fetched once, reused
                pl.BlockSpec((L, tn), lambda n: (0, n)),
            ],
            out_specs=[
                pl.BlockSpec((L, tn), lambda n: (0, n)),
                pl.BlockSpec((L, tn), lambda n: (0, n)),
            ],
        ),
        compiler_params=pltpu.CompilerParams(
            dimension_semantics=("parallel",),
            vmem_limit_bytes=vmem_limit,
        ),
        cost_estimate=cost,
    )(m, x2)

    res = res2[:, :N].reshape(L, B, C).transpose(1, 0, 2)
    mean = mean2[:, :N].reshape(L, B, C).transpose(1, 0, 2)
    return res, mean


# ----------------------------------------------------------------------------- demo
if __name__ == "__main__":
    kernel_size = 25  # Autoformer default (odd)
    key = jax.random.PRNGKey(0)

    def reference(x, k):
        # Pure-JAX reference matching the PyTorch module.
        p = (k - 1) // 2
        L = x.shape[1]
        front = jnp.repeat(x[:, :1, :], p, axis=1)
        end = jnp.repeat(x[:, -1:, :], p, axis=1)
        xp = jnp.concatenate([front, x, end], axis=1)
        windows = jnp.stack([xp[:, i:i + L, :] for i in range(k)], axis=0)
        mean = windows.mean(axis=0)
        return x - mean, mean

    fn = jax.jit(functools.partial(series_decomp, kernel_size=kernel_size))

    # Fast path (C % 128 == 0) and lane-narrow fallback path (C = 7).
    for (B, L, C) in [(2, 48, 128), (2, 32, 7)]:
        x = jax.random.normal(jax.random.fold_in(key, C), (B, L, C), dtype=jnp.float32)
        res, mean = fn(x)
        res, mean = jax.block_until_ready(res), jax.block_until_ready(mean)
        res_ref, mean_ref = reference(x, kernel_size)
        assert jnp.allclose(mean, mean_ref, atol=1e-5, rtol=1e-5), "moving_mean mismatch"
        assert jnp.allclose(res, res_ref, atol=1e-5, rtol=1e-5), "res mismatch"

    print("KERNEL_OK")
</pallas_src>

<mosaic_0001>
module attributes {stable_mosaic.version = 11 : i64} {
  func.func @_series_decomp_kernel_blc(%arg0: i32, %arg1: i32, %arg2: memref<48x48xf32, #tpu.memory_space<vmem>>, %arg3: memref<1x48x128xf32, #tpu.memory_space<vmem>>, %arg4: memref<1x48x128xf32, #tpu.memory_space<vmem>>, %arg5: memref<1x48x128xf32, #tpu.memory_space<vmem>>) attributes {dimension_semantics = [#tpu.dimension_semantics<parallel>, #tpu.dimension_semantics<parallel>], iteration_bounds = array<i64: 2, 1>, scalar_prefetch = 0 : i64, scratch_operands = 0 : i64, tpu.core_type = #tpu.core_type<tc>, window_params = [{pipeline_mode = #tpu.pipeline_mode<synchronous>, transform_indices = @transform_0, window_bounds = array<i64: 48, 48>}, {transform_indices = @transform_1, window_bounds = array<i64: 1, 48, 128>}, {transform_indices = @transform_2, window_bounds = array<i64: 1, 48, 128>}, {transform_indices = @transform_3, window_bounds = array<i64: 1, 48, 128>}]} {
    %c0 = arith.constant 0 : index
    %c0_0 = arith.constant 0 : index
    %c0_1 = arith.constant 0 : index
    %0 = vector.load %arg3[%c0, %c0_0, %c0_1] : memref<1x48x128xf32, #tpu.memory_space<vmem>>, vector<1x48x128xf32>
    %1 = vector.shape_cast %0 : vector<1x48x128xf32> to vector<48x128xf32>
    %c0_2 = arith.constant 0 : index
    %c0_3 = arith.constant 0 : index
    %2 = vector.load %arg2[%c0_2, %c0_3] : memref<48x48xf32, #tpu.memory_space<vmem>>, vector<48x48xf32>
    %cst = arith.constant dense<0.000000e+00> : vector<48x128xf32>
    %3 = tpu.matmul %2, %1, %cst {dimension_numbers = #tpu.dot_dimension_numbers<[1], [0], [0], [1], [0, 0, 1, 1], [], []>} : vector<48x48xf32>, vector<48x128xf32>, vector<48x128xf32> -> vector<48x128xf32>
    %c0_4 = arith.constant 0 : index
    %c0_5 = arith.constant 0 : index
    %c0_6 = arith.constant 0 : index
    %4 = vector.load %arg5[%c0_4, %c0_5, %c0_6] : memref<1x48x128xf32, #tpu.memory_space<vmem>>, vector<1x48x128xf32>
    %5 = vector.shape_cast %4 : vector<1x48x128xf32> to vector<48x128xf32>
    %6 = vector.shape_cast %3 : vector<48x128xf32> to vector<1x48x128xf32>
    tpu.vector_store %arg5[%c0_4, %c0_5, %c0_6], %6 {strides = array<i32>} : memref<1x48x128xf32, #tpu.memory_space<vmem>>, vector<1x48x128xf32>,
    %7 = arith.subf %1, %3 : vector<48x128xf32>
    %c0_7 = arith.constant 0 : index
    %c0_8 = arith.constant 0 : index
    %c0_9 = arith.constant 0 : index
    %8 = vector.load %arg4[%c0_7, %c0_8, %c0_9] : memref<1x48x128xf32, #tpu.memory_space<vmem>>, vector<1x48x128xf32>
    %9 = vector.shape_cast %8 : vector<1x48x128xf32> to vector<48x128xf32>
    %10 = vector.shape_cast %7 : vector<48x128xf32> to vector<1x48x128xf32>
    tpu.vector_store %arg4[%c0_7, %c0_8, %c0_9], %10 {strides = array<i32>} : memref<1x48x128xf32, #tpu.memory_space<vmem>>, vector<1x48x128xf32>,
    return
  }
  func.func @transform_0(%arg0: i32, %arg1: i32) -> (i32, i32) {
    %c0_i32 = arith.constant 0 : i32
    %c0_i32_0 = arith.constant 0 : i32
    %c0_i32_1 = arith.constant 0 : i32
    return %c0_i32, %c0_i32_0 : i32, i32
  }
  func.func @transform_1(%arg0: i32, %arg1: i32) -> (i32, i32, i32) {
    %c0_i32 = arith.constant 0 : i32
    %c0_i32_0 = arith.constant 0 : i32
    return %arg0, %c0_i32, %arg1 : i32, i32, i32
  }
  func.func @transform_2(%arg0: i32, %arg1: i32) -> (i32, i32, i32) {
    %c0_i32 = arith.constant 0 : i32
    %c0_i32_0 = arith.constant 0 : i32
    return %arg0, %c0_i32, %arg1 : i32, i32, i32
  }
  func.func @transform_3(%arg0: i32, %arg1: i32) -> (i32, i32, i32) {
    %c0_i32 = arith.constant 0 : i32
    %c0_i32_0 = arith.constant 0 : i32
    return %arg0, %c0_i32, %arg1 : i32, i32, i32
  }
}

</mosaic_0001>

<bundles_post_ra>
// kernel: series_decomp.1
= control target key start
LH: loop header
LB: loop body
LE: loop exit
PB: predicated region body
PF: predicated region fallthrough
CT: control target
= control target key end

     0   :  { %9 = vsyncpa [#allocation3], 0  ;;  %s1038_s0 = inlined_call_operand.hbm [shape: f32[48,48], index: 0, kind: input, shape index: {}]   ;;  %s1039_s1 = inlined_call_operand.hbm [shape: f32[2,48,128], index: 1, kind: input, shape index: {}]   ;;  %s1040_s2 = inlined_call_operand.hbm [shape: f32[2,48,128], index: 2, kind: output, shape index: {0}]   ;;  %s1041_s3 = inlined_call_operand.hbm [shape: f32[2,48,128], index: 3, kind: output, shape index: {1}]  }
   0x1   :  { %10 = vsyncpa [#allocation6], 0 }
   0x2   :  { %12 = vsyncpa [#allocation6 + $0x1], 0 }
   0x3   :  { %13 = vsyncpa [#allocation4], 0 }
   0x4   :  { %15 = vsyncpa [#allocation4 + $0x1], 0 }
   0x5   :  { %16 = vsyncpa [#allocation9], 0 }
   0x6   :  { %18 = vsyncpa [#allocation9 + $0x1], 0  ;;  %s822_s12 = smov 0   ;;  %s824_s13 = smov 0  }
   0x7   :  { %s826_s14 = smov 0   ;;  %s828_s15 = smov 0  }
   0x8   :  { %s830_s16 = smov 0   ;;  %s832_s17 = smov 0  }
   0x9 LB: > { %s494_s18 = sadd.s32 4294967295, %s795_s17   ;;  %s495_s19 = sadd.s32 4294967294, %s795_s17   ;;  %s795_s17 = sphi %s832_s17, %s24_s17   ;;  %s791_s16 = sphi %s830_s16, %s1052_s16   ;;  %s787_s15 = sphi %s828_s15, %s1051_s15   ;;  %s783_s14 = sphi %s826_s14, %s1050_s14   ;;  %s779_s13 = sphi %s824_s13, %s1049_s13   ;;  %s775_s12 = sphi %s822_s12, %s1048_s12  }
   0xa   : > { %p79_p0 = scmp.ne.s32.totalorder %s779_s13, %s775_s12  ;;  %p856_p1 = scmp.eq.s32.totalorder %s494_s18, 0 }
   0xb   : > { %p860_p2 = scmp.eq.s32.totalorder %s494_s18, 1  ;;  %p111_p3 = scmp.eq.s32.totalorder %s495_s19, 1 }
   0xc   : > { %p866_p4 = por %p856_p1, %p79_p0  ;;  %p496_p5 = scmp.ge.s32.totalorder %s795_s17, 1 }
   0xd   : > { %p871_p6 = por %p111_p3, %p79_p0  ;;  %p146_p7 = scmp.lt.s32.totalorder %s795_s17, 3 }
   0xe   : > { %s157_s26 = sshll.u32 %s1038_s0, 4  ;;  %s797_s28 = smov [#allocation2]   ;;  %s158_s26 = int_to_ptr.hbm [resolvable:$true] %s157_s26 }
   0xf   : > { %p879_p8 = pnand %p496_p5, %p146_p7  ;;  %s159_s29 = sshll.u32 %s797_s28, 4  ;;  %s160_s29 = int_to_ptr.vmem [resolvable:$true] %s159_s29 }
  0x10   : > { %p498_p11 = scmp.ge.s32.totalorder %s795_s17, 2  ;;  %s798_s30 = smov 128  }
  0x11   : > { %p545_p9 = pneg %p879_p8  ;;  %s799_s4 = smov 8  }
  0x12   : > { %s36_s5 = sadd.s32 1, %s791_s16  ;;  %s66_s6 = sadd.s32 1, %s783_s14 }
  0x13   : > { %p546_p10 = pnand %p545_p9, %p856_p1  ;;  %p38_p12 = scmp.ge.s32.totalorder %s36_s5, 2 }
  0x14   : > { %p73_p13 = scmp.ne.s32.totalorder %s783_s14, %s779_s13  ;;  %p74_p0 = scmp.eq.s32.totalorder %s795_s17, 0 }
  0x15   : > { %548 = dma.hbm_to_vmem [thread:$0]  (!%p546_p10), %s158_s26, 768, %s160_s29, [#allocation3], %s798_s30, %s798_s30, %s799_s4  }
  0x16   : > { %s1054_s5 = smov (%p38_p12, %s36_s5), 0  ;;  %p75_p3 = por %p74_p0, %p73_p13 }
  0x17   : > { %p900_p5 = por %p860_p2, %p73_p13  ;;  %s61_s8 = ssub.s32 %s791_s16, %s1054_s5 }
  0x18   : > { %p561_p7 = scmp.lt.s32.totalorder %s795_s17, 2  ;;  %p64_p9 = scmp.eq.s32.totalorder %s61_s8, 0 }
  0x19   : > { %s173_s9 = sand.u32 1, %s783_s14   ;;  %s531_s18 = smul.u32 48, %s791_s16 }
  0x1a   : > { %s530_s10 = smul.u32 48, %s173_s9  ;;  %p550_p10 = pnand %p561_p7, %p75_p3 }
  0x1b   : > { %s909_s11 = scalar_select %p64_p9, %s783_s14, %s66_s6  }
  0x1c   : > { %s177_s19 = scalar_lea.vmem [#allocation5], %s530_s10  ;;  %s183_s28 = scalar_lea.hbm %s1039_s1, %s531_s18 }
  0x1d   : > { %s186_s24 = sshll.u32 %s177_s19, 4  ;;  %s184_s21 = sshll.u32 %s183_s28, 4  ;;  %s187_s24 = int_to_ptr.vmem [resolvable:$true] %s186_s24  ;;  %s185_s21 = int_to_ptr.hbm [resolvable:$true] %s184_s21 }
  0x1e   : > { %s174_s29 = scalar_lea.sflag [#allocation6], %s173_s9  ;;  %198 = sbr.rel (%p879_p8) target bundleno = 209 (0xd1), region = 28 }
  0x1f   : > { %552 = dma.hbm_to_vmem [thread:$0]  (!%p550_p10), %s185_s21, 768, %s187_s24, %s174_s29, %s798_s30, %s798_s30, %s799_s4  }
  0x23   : > { %758 = dma.done.wait (%p856_p1), [#allocation3], 768  }
  0x24   : > { %760 = vsyncadd (%p856_p1), [#allocation3], 4294966528  ;;  %s925_s6 = sand.u32 1, %s779_s13  }
  0x25   : > { %s928_s8 = smul.u32 48, %s925_s6  ;;  %s206_s9 = scalar_lea.sflag [#allocation6], %s925_s6 }
  0x27   : > { %s209_s30 = scalar_lea.vmem [#allocation5], %s928_s8 }
  0x28   : > { %762 = dma.done.wait (%p866_p4), %s206_s9, 768  }
  0x29   : > { %764 = vsyncadd (%p866_p4), %s206_s9, 4294966528  ;;  %v936_v0 = vld [vmem:[%s209_s30 + $0x28] sm:$0xff]  ;;  %v242_v1 = vld [vmem:[%s209_s30 + $0x20] sm:$0xff]  ;;  %vm250_vm0 = vcmask 392192   ;;  %s955_s20 = scalar_lea.vmem [#allocation8], %s928_s8  ;;  %s959_s22 = scalar_lea.vmem [#allocation7], %s928_s8 }
  0x2a   : > { %514 = vmatpush.msra.mxu3 %v936_v0  ;;  %512 = vmatpush.msra.mxu1 %v936_v0  ;;  %v940_v2 = vld [vmem:[%s209_s30 + $0x18] sm:$0xff]  ;;  %v240_v3 = vld [vmem:[%s209_s30 + $0x10] sm:$0xff]  ;;  %v239_v4 = vld [vmem:[%s209_s30 + $0x8] sm:$0xff]  ;;  %s533_s27 = smul.u32 48, %s787_s15  ;;  %s359_s19 = sshll.u32 %s955_s20, 4  ;;  %s977_s19 = int_to_ptr.vmem [resolvable:$true] %s359_s19 }
  0x2b   : > { %513 = vmatpush.msra.mxu2 %v936_v0  ;;  %279 = vmatpush.msra.mxu0 %v936_v0  ;;  %v238_v5 = vld [vmem:[%s209_s30] sm:$0xff]  ;;  %v245_v7 = vld [vmem:[#allocation2 + $0x8] sm:$0xff]  ;;  %v247_v8 = vld [vmem:[#allocation2 + $0x18] sm:$0xff]  ;;  %s341_s26 = sshll.u32 %s959_s22, 4  ;;  %s328_s29 = scalar_lea.sflag [#allocation9], %s925_s6  ;;  %s982_s26 = int_to_ptr.vmem [resolvable:$true] %s341_s26 }
  0x2c   : > { %517 = vmatpush.msra.mxu3 %v242_v1  ;;  %515 = vmatpush.msra.mxu1 %v242_v1  ;;  %v248_v6 = vld [vmem:[#allocation2 + $0x20] sm:$0xff]  ;;  %v249_v10 = vld [vmem:[#allocation2 + $0x28] sm:$0xff]  ;;  %v246_v11 = vld [vmem:[#allocation2 + $0x10] sm:$0xff]  ;;  %s358_s18 = scalar_lea.hbm %s1041_s3, %s533_s27  ;;  %s340_s15 = scalar_lea.hbm %s1040_s2, %s533_s27 }
  0x2d   : > { %516 = vmatpush.msra.mxu2 %v242_v1  ;;  %280 = vmatpush.msra.mxu0 %v242_v1  ;;  %v244_v9 = vld [vmem:[#allocation2] sm:$0xff]  ;;  %s361_s28 = sshll.u32 %s358_s18, 4  ;;  %s343_s21 = sshll.u32 %s340_s15, 4  ;;  %s362_s28 = int_to_ptr.hbm [resolvable:$true] %s361_s28  ;;  %s986_s21 = int_to_ptr.hbm [resolvable:$true] %s343_s21 }
  0x2e   : > { %520 = vmatpush.msra.mxu3 %v940_v2  ;;  %518 = vmatpush.msra.mxu1 %v940_v2  ;;  %s691_s8 = sshra.s32 %s362_s28, 4  ;;  %s697_s4 = scalar_lea.hbm %s1041_s3, 96  ;;  %s692_s8 = int_to_ptr.hbm [resolvable:$true] %s691_s8 }
  0x2f   : > { %519 = vmatpush.msra.mxu2 %v940_v2  ;;  %281 = vmatpush.msra.mxu0 %v940_v2  ;;  %s693_s9 = scalar_lea.hbm %s692_s8, 48  ;;  %p698_p8 = scmp.lt.s32.totalorder %s692_s8, %s1041_s3 }
  0x30   : > { %523 = vmatpush.msra.mxu3 %v240_v3  ;;  %521 = vmatpush.msra.mxu1 %v240_v3  ;;  %p694_p1 = scmp.ne.s32.totalorder %s692_s8, %s693_s9  ;;  %p699_p12 = scmp.lt.s32.totalorder %s697_s4, %s693_s9 }
  0x31   : > { %522 = vmatpush.msra.mxu2 %v240_v3  ;;  %282 = vmatpush.msra.mxu0 %v240_v3 }
  0x32   : > { %526 = vmatpush.msra.mxu3 %v239_v4  ;;  %524 = vmatpush.msra.mxu1 %v239_v4  ;;  %p695_p2 = pnand %p694_p1, %p900_p5  ;;  %p700_p13 = por %p699_p12, %p698_p8 }
  0x33   : > { %525 = vmatpush.msra.mxu2 %v239_v4  ;;  %283 = vmatpush.msra.mxu0 %v239_v4 }
  0x34   : > { %529 = vmatpush.msra.mxu3 %v238_v5  ;;  %527 = vmatpush.msra.mxu1 %v238_v5  ;;  %p696_p4 = pneg %p695_p2 }
  0x35   : > { %506 = vmatmul.msk.f32.vlgmr.msra.gmra.mxu3 %vm250_vm0, %v248_v6  ;;  %503 = vmatmul.msk.f32.vlgmr.msra.gmra.mxu1 %vm250_vm0, %v245_v7 }
  0x36   : > { %528 = vmatpush.msra.mxu2 %v238_v5  ;;  %284 = vmatpush.msra.mxu0 %v238_v5  ;;  %p701_p0 = pnand %p700_p13, %p696_p4 }
  0x37   : > { %505 = vmatmul.msk.f32.vlgmr.msra.gmra.mxu2 %vm250_vm0, %v247_v8  ;;  %502 = vmatmul.msk.f32.vlgmr.msra.gmra.mxu0 %vm250_vm0, %v244_v9 }
  0x3d   : > { %507 = vmatmul.msk.f32.gmra.mxu3 %vm250_vm0, %v249_v10  ;;  %504 = vmatmul.msk.f32.gmra.mxu1 %vm250_vm0, %v246_v11 }
  0xb2   : > { %v289_v12 = vpop.f32.mrf.mxu1 }
  0xb3   : > { %305 = vst [vmem:[%s955_s20 + $0x8] sm:$0xff] %v289_v12  ;;  %v311_v13 = vsub.f32 %v239_v4, %v289_v12 }
  0xb4   : > { %v286_v14 = vpop.f32.mrf.mxu0 }
  0xb5   : > { %317 = vst [vmem:[%s959_s22 + $0x8] sm:$0xff] %v311_v13  ;;  %v310_v15 = vsub.f32 %v238_v5, %v286_v14 }
  0xb6   : > { %304 = vst [vmem:[%s955_s20] sm:$0xff] %v286_v14 }
  0xb7   : > { %316 = vst [vmem:[%s959_s22] sm:$0xff] %v310_v15 }
  0xb8   : > { %v298_v16 = vpop.f32.mrf.mxu3 }
  0xb9   : > { %308 = vst [vmem:[%s955_s20 + $0x20] sm:$0xff] %v298_v16  ;;  %v314_v17 = vsub.f32 %v242_v1, %v298_v16 }
  0xba   : > { %v292_v18 = vpop.f32.mrf.mxu1  ;;  %v295_v19 = vpop.f32.mrf.mxu2 }
  0xbb   : > { %320 = vst [vmem:[%s959_s22 + $0x20] sm:$0xff] %v314_v17  ;;  %v312_v20 = vsub.f32 %v240_v3, %v292_v18  ;;  %v313_v21 = vsub.f32 %v940_v2, %v295_v19 }
  0xbc   : > { %306 = vst [vmem:[%s955_s20 + $0x10] sm:$0xff] %v292_v18 }
  0xbd   : > { %318 = vst [vmem:[%s959_s22 + $0x10] sm:$0xff] %v312_v20 }
  0xbe   : > { %307 = vst [vmem:[%s955_s20 + $0x18] sm:$0xff] %v295_v19 }
  0xbf   : > { %319 = vst [vmem:[%s959_s22 + $0x18] sm:$0xff] %v313_v21 }
  0xc0   : > { %v301_v22 = vpop.f32.mrf.mxu3 }
  0xc1   : > { %309 = vst [vmem:[%s955_s20 + $0x28] sm:$0xff] %v301_v22  ;;  %v315_v23 = vsub.f32 %v936_v0, %v301_v22 }
  0xc2   : > { %704 = shalt.err (!%p701_p0)
}
  0xc3   : > { %s800_s20 = smov 128   ;;  %s801_s24 = smov 8   ;;  %321 = vst [vmem:[%s959_s22 + $0x28] sm:$0xff] %v315_v23 }
  0xc4   : > { %542 = dma.vmem_to_hbm [thread:$0]  (%p900_p5), %s977_s19, 768, %s362_s28, %s328_s29, %s800_s20, %s800_s20, %s801_s24  }
  0xc5   : > { %s323_s25 = scalar_lea.sflag [#allocation4], %s925_s6  ;;  %s719_s15 = sshra.s32 %s986_s21, 4  ;;  %s720_s15 = int_to_ptr.hbm [resolvable:$true] %s719_s15 }
  0xc6   : > { %s721_s30 = scalar_lea.hbm %s720_s15, 48  ;;  %s725_s27 = scalar_lea.hbm %s1040_s2, 96 }
  0xc7   : > { %p722_p3 = scmp.ne.s32.totalorder %s720_s15, %s721_s30  ;;  %p726_p10 = scmp.lt.s32.totalorder %s720_s15, %s1040_s2 }
  0xc8   : > { %p727_p1 = scmp.lt.s32.totalorder %s725_s27, %s721_s30 }
  0xc9   : > { %p723_p7 = pnand %p722_p3, %p900_p5 }
  0xca   : > { %p728_p2 = por %p727_p1, %p726_p10 }
  0xcb   : > { %p724_p9 = pneg %p723_p7 }
  0xcd   : > { %p729_p4 = pnand %p728_p2, %p724_p9 }
  0xcf   : > { %732 = shalt.err (!%p729_p4)
}
  0xd0   : > { %541 = dma.vmem_to_hbm [thread:$0]  (%p900_p5), %s982_s26, 768, %s986_s21, %s323_s25, %s800_s20, %s800_s20, %s801_s24  }
  0xd1 PF: > { %s376_s6 = sand.u32 1, %s775_s12   ;;  %p554_p8 = pnand %p498_p11, %p871_p6 }
  0xd2   : > { %s377_s22 = scalar_lea.sflag [#allocation4], %s376_s6 }
  0xd3   : > { %p555_p12 = pneg %p554_p8 }
  0xd5   : > { %766 = dma.done.wait (%p555_p12), %s377_s22, 768  }
  0xd6   : > { %768 = vsyncadd (%p555_p12), %s377_s22, 4294966528  ;;  %s387_s19 = scalar_lea.sflag [#allocation9], %s376_s6 }
  0xd7   : > { %770 = dma.done.wait (%p555_p12), %s387_s19, 768  }
  0xd8   : > { %772 = vsyncadd (%p555_p12), %s387_s19, 4294966528  ;;  %s24_s17 = sadd.s32 1, %s795_s17   ;;  %s1048_s12 = smov %s779_s13 }
  0xd9   : > { %p21_p13 = scmp.ge.s32.totalorder %s24_s17, 4   ;;  %s1049_s13 = smov %s783_s14 }
  0xda   : > { %s1050_s14 = smov %s909_s11  ;;  %s1051_s15 = smov %s791_s16 }
  0xdb   : > { %s1052_s16 = smov %s1054_s5  ;;  %23 = sbr.rel (!%p21_p13) target bundleno = 9 (0x9), region = 95 }
  0xe0   :  { %393 = vsyncpa [#allocation3], 1 }
  0xe1   :  { %395 = vsyncpa [#allocation3 + $0x1], 1 }
  0xe2   :  { %396 = vsyncpa [#allocation6], 1 }
  0xe3   :  { %398 = vsyncpa [#allocation6 + $0x1], 1 }
  0xe4   :  { %399 = vsyncpa [#allocation4], 1 }
  0xe5   :  { %401 = vsyncpa [#allocation4 + $0x1], 1 }
  0xe6   :  { %402 = vsyncpa [#allocation9], 1 }
  0xe7   :  { %404 = vsyncpa [#allocation9 + $0x1], 1 }

</bundles_post_ra>
